<compile_context>
chip_gen: v5e
topology: v5e:2x2
jax: 0.10.0
libtpu: 0.0.40
codegen_flags: <defaults>
</compile_context>

<pallas_src>
import jax
import jax.numpy as jnp
from jax.experimental import pallas as pl
from jax.experimental.pallas import tpu as pltpu

NUM_MF = 3
NUM_RULES = NUM_MF * NUM_MF
LANES = 128

# Packed parameter layout (all float32, total 39 scalars):
#   [0:3)   mean1      [3:6)   inv_sigma1
#   [6:9)   mean2      [9:12)  inv_sigma2
#   [12:21) a1         [21:30) a2          [30:39) b
_MEAN1, _ISIG1, _MEAN2, _ISIG2, _A1, _A2, _B = 0, 3, 6, 9, 12, 21, 30


def anfis_kernel(p_ref, x1_ref, x2_ref, o_ref):
    x1 = x1_ref[...]                      # (row_tile, 128) lane-dense batch
    x2 = x2_ref[...]

    # Gaussian memberships, unrolled per MF; scalar params broadcast from SMEM.
    mf1 = []
    mf2 = []
    for i in range(NUM_MF):
        z1 = (x1 - p_ref[_MEAN1 + i]) * p_ref[_ISIG1 + i]
        mf1.append(jnp.exp(-0.5 * z1 * z1))
        z2 = (x2 - p_ref[_MEAN2 + i]) * p_ref[_ISIG2 + i]
        mf2.append(jnp.exp(-0.5 * z2 * z2))

    # Unrolled 9 rules: running sums for the normalizer and for sum(rule * f).
    denom = None
    num = None
    for i in range(NUM_MF):
        for j in range(NUM_MF):
            k = i * NUM_MF + j            # row-major flatten == reshape(-1, 9)
            w = mf1[i] * mf2[j]
            f = jnp.tanh(p_ref[_A1 + k] * x1 + p_ref[_A2 + k] * x2 + p_ref[_B + k])
            denom = w if denom is None else denom + w
            num = w * f if num is None else num + w * f

    # Normalization folded into one exact divide (instead of 9 per-rule divides).
    o_ref[...] = num / denom


def anfis_forward(x, params, *, row_tile=512):
    """x: (B, 2) float32; params = (mean1, sigma1, mean2, sigma2, a1, a2, b)."""
    B = x.shape[0]
    mean1, sigma1, mean2, sigma2, a1, a2, b = params

    packed = jnp.concatenate(
        [mean1, 1.0 / sigma1, mean2, 1.0 / sigma2, a1, a2, b]
    ).astype(jnp.float32)                 # (39,) -> SMEM via scalar prefetch

    # Lane-dense batch layout: pad B up to whole (row_tile, 128) tiles.
    rows_needed = -(-B // LANES)
    row_tile = max(8, min(row_tile, -(-rows_needed // 8) * 8))   # multiple of 8
    rows = -(-rows_needed // row_tile) * row_tile
    Bp = rows * LANES

    x1 = x[:, 0].astype(jnp.float32)
    x2 = x[:, 1].astype(jnp.float32)
    pad = Bp - B
    if pad:
        zeros = jnp.zeros((pad,), jnp.float32)   # pad value 0 keeps denom > 0
        x1 = jnp.concatenate([x1, zeros])
        x2 = jnp.concatenate([x2, zeros])
    x1 = x1.reshape(rows, LANES)
    x2 = x2.reshape(rows, LANES)

    slab_spec = pl.BlockSpec((row_tile, LANES), lambda i, p: (i, 0))

    out = pl.pallas_call(
        anfis_kernel,
        out_shape=jax.ShapeDtypeStruct((rows, LANES), jnp.float32),
        grid_spec=pltpu.PrefetchScalarGridSpec(
            num_scalar_prefetch=1,
            grid=(rows // row_tile,),
            in_specs=[slab_spec, slab_spec],      # x1, x2
            out_specs=slab_spec,                  # y, lane-dense
        ),
        compiler_params=pltpu.CompilerParams(
            dimension_semantics=("parallel",)),
    )(packed, x1, x2)

    return out.reshape(Bp)[:B]


def reference_forward(x, params):
    """Pure-JAX reference mirroring the PyTorch forward exactly."""
    mean1, sigma1, mean2, sigma2, a1, a2, b = params
    x1, x2 = x[:, 0], x[:, 1]
    mf1 = jnp.exp(-0.5 * ((x1[:, None] - mean1) / sigma1) ** 2)
    mf2 = jnp.exp(-0.5 * ((x2[:, None] - mean2) / sigma2) ** 2)
    rule = jnp.einsum('bi,bj->bij', mf1, mf2).reshape(-1, NUM_RULES)
    weights = rule / rule.sum(axis=1, keepdims=True)
    f = jnp.tanh(a1 * x1[:, None] + a2 * x2[:, None] + b)
    return jnp.sum(weights * f, axis=1)


if __name__ == "__main__":
    key = jax.random.PRNGKey(0)
    k_x, k_a1, k_a2, k_b = jax.random.split(key, 4)

    B = 2500   # small, non-multiple of the tile to exercise the padding path

    # Inputs in [0, 1] like normalized rainfall / water-level features.
    x = jax.random.uniform(k_x, (B, 2), dtype=jnp.float32)

    # Deterministic parameter init matching the module's __init__ shapes.
    mean1 = jnp.linspace(0.2, 0.8, NUM_MF, dtype=jnp.float32)
    sigma1 = jnp.full((NUM_MF,), 0.1, dtype=jnp.float32)
    mean2 = jnp.linspace(0.2, 0.8, NUM_MF, dtype=jnp.float32)
    sigma2 = jnp.full((NUM_MF,), 0.1, dtype=jnp.float32)
    a1 = jax.random.normal(k_a1, (NUM_RULES,), dtype=jnp.float32)
    a2 = jax.random.normal(k_a2, (NUM_RULES,), dtype=jnp.float32)
    b = jax.random.normal(k_b, (NUM_RULES,), dtype=jnp.float32)

    params = (mean1, sigma1, mean2, sigma2, a1, a2, b)

    # row_tile=8 here so the tiny test still exercises a multi-step grid
    # (production batches should use the larger default row_tile).
    y = anfis_forward(x, params, row_tile=8)
    y = jax.block_until_ready(y)

    y_ref = reference_forward(x, params)
    assert y.shape == (B,)
    assert jnp.allclose(y, y_ref, atol=1e-5, rtol=1e-5), (y, y_ref)

    print("KERNEL_OK")
</pallas_src>

<mosaic_0001>
module attributes {stable_mosaic.version = 11 : i64} {
  func.func @anfis_kernel(%arg0: i32, %arg1: memref<39xf32, #tpu.memory_space<smem>>, %arg2: memref<8x128xf32, #tpu.memory_space<vmem>>, %arg3: memref<8x128xf32, #tpu.memory_space<vmem>>, %arg4: memref<8x128xf32, #tpu.memory_space<vmem>>) attributes {dimension_semantics = [#tpu.dimension_semantics<parallel>], iteration_bounds = array<i64: 3>, scalar_prefetch = 1 : i64, scratch_operands = 0 : i64, tpu.core_type = #tpu.core_type<tc>, window_params = [{transform_indices = @transform_0, window_bounds = array<i64: 8, 128>}, {transform_indices = @transform_1, window_bounds = array<i64: 8, 128>}, {transform_indices = @transform_2, window_bounds = array<i64: 8, 128>}]} {
    %c0 = arith.constant 0 : index
    %c0_0 = arith.constant 0 : index
    %0 = vector.load %arg2[%c0, %c0_0] : memref<8x128xf32, #tpu.memory_space<vmem>>, vector<8x128xf32>
    %c0_1 = arith.constant 0 : index
    %c0_2 = arith.constant 0 : index
    %1 = vector.load %arg3[%c0_1, %c0_2] : memref<8x128xf32, #tpu.memory_space<vmem>>, vector<8x128xf32>
    %c0_3 = arith.constant 0 : index
    %2 = memref.load %arg1[%c0_3] : memref<39xf32, #tpu.memory_space<smem>>
    %3 = vector.broadcast %2 : f32 to vector<8x128xf32>
    %4 = arith.subf %0, %3 : vector<8x128xf32>
    %c3 = arith.constant 3 : index
    %5 = memref.load %arg1[%c3] : memref<39xf32, #tpu.memory_space<smem>>
    %6 = vector.broadcast %5 : f32 to vector<8x128xf32>
    %7 = arith.mulf %4, %6 : vector<8x128xf32>
    %cst = arith.constant -5.000000e-01 : f32
    %8 = vector.broadcast %cst : f32 to vector<8x128xf32>
    %9 = arith.mulf %8, %7 : vector<8x128xf32>
    %10 = arith.mulf %9, %7 : vector<8x128xf32>
    %11 = math.exp %10 : vector<8x128xf32>
    %c6 = arith.constant 6 : index
    %12 = memref.load %arg1[%c6] : memref<39xf32, #tpu.memory_space<smem>>
    %13 = vector.broadcast %12 : f32 to vector<8x128xf32>
    %14 = arith.subf %1, %13 : vector<8x128xf32>
    %c9 = arith.constant 9 : index
    %15 = memref.load %arg1[%c9] : memref<39xf32, #tpu.memory_space<smem>>
    %16 = vector.broadcast %15 : f32 to vector<8x128xf32>
    %17 = arith.mulf %14, %16 : vector<8x128xf32>
    %cst_4 = arith.constant -5.000000e-01 : f32
    %18 = vector.broadcast %cst_4 : f32 to vector<8x128xf32>
    %19 = arith.mulf %18, %17 : vector<8x128xf32>
    %20 = arith.mulf %19, %17 : vector<8x128xf32>
    %21 = math.exp %20 : vector<8x128xf32>
    %c1 = arith.constant 1 : index
    %22 = memref.load %arg1[%c1] : memref<39xf32, #tpu.memory_space<smem>>
    %23 = vector.broadcast %22 : f32 to vector<8x128xf32>
    %24 = arith.subf %0, %23 : vector<8x128xf32>
    %c4 = arith.constant 4 : index
    %25 = memref.load %arg1[%c4] : memref<39xf32, #tpu.memory_space<smem>>
    %26 = vector.broadcast %25 : f32 to vector<8x128xf32>
    %27 = arith.mulf %24, %26 : vector<8x128xf32>
    %cst_5 = arith.constant -5.000000e-01 : f32
    %28 = vector.broadcast %cst_5 : f32 to vector<8x128xf32>
    %29 = arith.mulf %28, %27 : vector<8x128xf32>
    %30 = arith.mulf %29, %27 : vector<8x128xf32>
    %31 = math.exp %30 : vector<8x128xf32>
    %c7 = arith.constant 7 : index
    %32 = memref.load %arg1[%c7] : memref<39xf32, #tpu.memory_space<smem>>
    %33 = vector.broadcast %32 : f32 to vector<8x128xf32>
    %34 = arith.subf %1, %33 : vector<8x128xf32>
    %c10 = arith.constant 10 : index
    %35 = memref.load %arg1[%c10] : memref<39xf32, #tpu.memory_space<smem>>
    %36 = vector.broadcast %35 : f32 to vector<8x128xf32>
    %37 = arith.mulf %34, %36 : vector<8x128xf32>
    %cst_6 = arith.constant -5.000000e-01 : f32
    %38 = vector.broadcast %cst_6 : f32 to vector<8x128xf32>
    %39 = arith.mulf %38, %37 : vector<8x128xf32>
    %40 = arith.mulf %39, %37 : vector<8x128xf32>
    %41 = math.exp %40 : vector<8x128xf32>
    %c2 = arith.constant 2 : index
    %42 = memref.load %arg1[%c2] : memref<39xf32, #tpu.memory_space<smem>>
    %43 = vector.broadcast %42 : f32 to vector<8x128xf32>
    %44 = arith.subf %0, %43 : vector<8x128xf32>
    %c5 = arith.constant 5 : index
    %45 = memref.load %arg1[%c5] : memref<39xf32, #tpu.memory_space<smem>>
    %46 = vector.broadcast %45 : f32 to vector<8x128xf32>
    %47 = arith.mulf %44, %46 : vector<8x128xf32>
    %cst_7 = arith.constant -5.000000e-01 : f32
    %48 = vector.broadcast %cst_7 : f32 to vector<8x128xf32>
    %49 = arith.mulf %48, %47 : vector<8x128xf32>
    %50 = arith.mulf %49, %47 : vector<8x128xf32>
    %51 = math.exp %50 : vector<8x128xf32>
    %c8 = arith.constant 8 : index
    %52 = memref.load %arg1[%c8] : memref<39xf32, #tpu.memory_space<smem>>
    %53 = vector.broadcast %52 : f32 to vector<8x128xf32>
    %54 = arith.subf %1, %53 : vector<8x128xf32>
    %c11 = arith.constant 11 : index
    %55 = memref.load %arg1[%c11] : memref<39xf32, #tpu.memory_space<smem>>
    %56 = vector.broadcast %55 : f32 to vector<8x128xf32>
    %57 = arith.mulf %54, %56 : vector<8x128xf32>
    %cst_8 = arith.constant -5.000000e-01 : f32
    %58 = vector.broadcast %cst_8 : f32 to vector<8x128xf32>
    %59 = arith.mulf %58, %57 : vector<8x128xf32>
    %60 = arith.mulf %59, %57 : vector<8x128xf32>
    %61 = math.exp %60 : vector<8x128xf32>
    %62 = arith.mulf %11, %21 : vector<8x128xf32>
    %c12 = arith.constant 12 : index
    %63 = memref.load %arg1[%c12] : memref<39xf32, #tpu.memory_space<smem>>
    %64 = vector.broadcast %63 : f32 to vector<8x128xf32>
    %65 = arith.mulf %64, %0 : vector<8x128xf32>
    %c21 = arith.constant 21 : index
    %66 = memref.load %arg1[%c21] : memref<39xf32, #tpu.memory_space<smem>>
    %67 = vector.broadcast %66 : f32 to vector<8x128xf32>
    %68 = arith.mulf %67, %1 : vector<8x128xf32>
    %69 = arith.addf %65, %68 : vector<8x128xf32>
    %c30 = arith.constant 30 : index
    %70 = memref.load %arg1[%c30] : memref<39xf32, #tpu.memory_space<smem>>
    %71 = vector.broadcast %70 : f32 to vector<8x128xf32>
    %72 = arith.addf %69, %71 : vector<8x128xf32>
    %73 = math.tanh %72 : vector<8x128xf32>
    %74 = arith.mulf %62, %73 : vector<8x128xf32>
    %75 = arith.mulf %11, %41 : vector<8x128xf32>
    %c13 = arith.constant 13 : index
    %76 = memref.load %arg1[%c13] : memref<39xf32, #tpu.memory_space<smem>>
    %77 = vector.broadcast %76 : f32 to vector<8x128xf32>
    %78 = arith.mulf %77, %0 : vector<8x128xf32>
    %c22 = arith.constant 22 : index
    %79 = memref.load %arg1[%c22] : memref<39xf32, #tpu.memory_space<smem>>
    %80 = vector.broadcast %79 : f32 to vector<8x128xf32>
    %81 = arith.mulf %80, %1 : vector<8x128xf32>
    %82 = arith.addf %78, %81 : vector<8x128xf32>
    %c31 = arith.constant 31 : index
    %83 = memref.load %arg1[%c31] : memref<39xf32, #tpu.memory_space<smem>>
    %84 = vector.broadcast %83 : f32 to vector<8x128xf32>
    %85 = arith.addf %82, %84 : vector<8x128xf32>
    %86 = math.tanh %85 : vector<8x128xf32>
    %87 = arith.addf %62, %75 : vector<8x128xf32>
    %88 = arith.mulf %75, %86 : vector<8x128xf32>
    %89 = arith.addf %74, %88 : vector<8x128xf32>
    %90 = arith.mulf %11, %61 : vector<8x128xf32>
    %c14 = arith.constant 14 : index
    %91 = memref.load %arg1[%c14] : memref<39xf32, #tpu.memory_space<smem>>
    %92 = vector.broadcast %91 : f32 to vector<8x128xf32>
    %93 = arith.mulf %92, %0 : vector<8x128xf32>
    %c23 = arith.constant 23 : index
    %94 = memref.load %arg1[%c23] : memref<39xf32, #tpu.memory_space<smem>>
    %95 = vector.broadcast %94 : f32 to vector<8x128xf32>
    %96 = arith.mulf %95, %1 : vector<8x128xf32>
    %97 = arith.addf %93, %96 : vector<8x128xf32>
    %c32 = arith.constant 32 : index
    %98 = memref.load %arg1[%c32] : memref<39xf32, #tpu.memory_space<smem>>
    %99 = vector.broadcast %98 : f32 to vector<8x128xf32>
    %100 = arith.addf %97, %99 : vector<8x128xf32>
    %101 = math.tanh %100 : vector<8x128xf32>
    %102 = arith.addf %87, %90 : vector<8x128xf32>
    %103 = arith.mulf %90, %101 : vector<8x128xf32>
    %104 = arith.addf %89, %103 : vector<8x128xf32>
    %105 = arith.mulf %31, %21 : vector<8x128xf32>
    %c15 = arith.constant 15 : index
    %106 = memref.load %arg1[%c15] : memref<39xf32, #tpu.memory_space<smem>>
    %107 = vector.broadcast %106 : f32 to vector<8x128xf32>
    %108 = arith.mulf %107, %0 : vector<8x128xf32>
    %c24 = arith.constant 24 : index
    %109 = memref.load %arg1[%c24] : memref<39xf32, #tpu.memory_space<smem>>
    %110 = vector.broadcast %109 : f32 to vector<8x128xf32>
    %111 = arith.mulf %110, %1 : vector<8x128xf32>
    %112 = arith.addf %108, %111 : vector<8x128xf32>
    %c33 = arith.constant 33 : index
    %113 = memref.load %arg1[%c33] : memref<39xf32, #tpu.memory_space<smem>>
    %114 = vector.broadcast %113 : f32 to vector<8x128xf32>
    %115 = arith.addf %112, %114 : vector<8x128xf32>
    %116 = math.tanh %115 : vector<8x128xf32>
    %117 = arith.addf %102, %105 : vector<8x128xf32>
    %118 = arith.mulf %105, %116 : vector<8x128xf32>
    %119 = arith.addf %104, %118 : vector<8x128xf32>
    %120 = arith.mulf %31, %41 : vector<8x128xf32>
    %c16 = arith.constant 16 : index
    %121 = memref.load %arg1[%c16] : memref<39xf32, #tpu.memory_space<smem>>
    %122 = vector.broadcast %121 : f32 to vector<8x128xf32>
    %123 = arith.mulf %122, %0 : vector<8x128xf32>
    %c25 = arith.constant 25 : index
    %124 = memref.load %arg1[%c25] : memref<39xf32, #tpu.memory_space<smem>>
    %125 = vector.broadcast %124 : f32 to vector<8x128xf32>
    %126 = arith.mulf %125, %1 : vector<8x128xf32>
    %127 = arith.addf %123, %126 : vector<8x128xf32>
    %c34 = arith.constant 34 : index
    %128 = memref.load %arg1[%c34] : memref<39xf32, #tpu.memory_space<smem>>
    %129 = vector.broadcast %128 : f32 to vector<8x128xf32>
    %130 = arith.addf %127, %129 : vector<8x128xf32>
    %131 = math.tanh %130 : vector<8x128xf32>
    %132 = arith.addf %117, %120 : vector<8x128xf32>
    %133 = arith.mulf %120, %131 : vector<8x128xf32>
    %134 = arith.addf %119, %133 : vector<8x128xf32>
    %135 = arith.mulf %31, %61 : vector<8x128xf32>
    %c17 = arith.constant 17 : index
    %136 = memref.load %arg1[%c17] : memref<39xf32, #tpu.memory_space<smem>>
    %137 = vector.broadcast %136 : f32 to vector<8x128xf32>
    %138 = arith.mulf %137, %0 : vector<8x128xf32>
    %c26 = arith.constant 26 : index
    %139 = memref.load %arg1[%c26] : memref<39xf32, #tpu.memory_space<smem>>
    %140 = vector.broadcast %139 : f32 to vector<8x128xf32>
    %141 = arith.mulf %140, %1 : vector<8x128xf32>
    %142 = arith.addf %138, %141 : vector<8x128xf32>
    %c35 = arith.constant 35 : index
    %143 = memref.load %arg1[%c35] : memref<39xf32, #tpu.memory_space<smem>>
    %144 = vector.broadcast %143 : f32 to vector<8x128xf32>
    %145 = arith.addf %142, %144 : vector<8x128xf32>
    %146 = math.tanh %145 : vector<8x128xf32>
    %147 = arith.addf %132, %135 : vector<8x128xf32>
    %148 = arith.mulf %135, %146 : vector<8x128xf32>
    %149 = arith.addf %134, %148 : vector<8x128xf32>
    %150 = arith.mulf %51, %21 : vector<8x128xf32>
    %c18 = arith.constant 18 : index
    %151 = memref.load %arg1[%c18] : memref<39xf32, #tpu.memory_space<smem>>
    %152 = vector.broadcast %151 : f32 to vector<8x128xf32>
    %153 = arith.mulf %152, %0 : vector<8x128xf32>
    %c27 = arith.constant 27 : index
    %154 = memref.load %arg1[%c27] : memref<39xf32, #tpu.memory_space<smem>>
    %155 = vector.broadcast %154 : f32 to vector<8x128xf32>
    %156 = arith.mulf %155, %1 : vector<8x128xf32>
    %157 = arith.addf %153, %156 : vector<8x128xf32>
    %c36 = arith.constant 36 : index
    %158 = memref.load %arg1[%c36] : memref<39xf32, #tpu.memory_space<smem>>
    %159 = vector.broadcast %158 : f32 to vector<8x128xf32>
    %160 = arith.addf %157, %159 : vector<8x128xf32>
    %161 = math.tanh %160 : vector<8x128xf32>
    %162 = arith.addf %147, %150 : vector<8x128xf32>
    %163 = arith.mulf %150, %161 : vector<8x128xf32>
    %164 = arith.addf %149, %163 : vector<8x128xf32>
    %165 = arith.mulf %51, %41 : vector<8x128xf32>
    %c19 = arith.constant 19 : index
    %166 = memref.load %arg1[%c19] : memref<39xf32, #tpu.memory_space<smem>>
    %167 = vector.broadcast %166 : f32 to vector<8x128xf32>
    %168 = arith.mulf %167, %0 : vector<8x128xf32>
    %c28 = arith.constant 28 : index
    %169 = memref.load %arg1[%c28] : memref<39xf32, #tpu.memory_space<smem>>
    %170 = vector.broadcast %169 : f32 to vector<8x128xf32>
    %171 = arith.mulf %170, %1 : vector<8x128xf32>
    %172 = arith.addf %168, %171 : vector<8x128xf32>
    %c37 = arith.constant 37 : index
    %173 = memref.load %arg1[%c37] : memref<39xf32, #tpu.memory_space<smem>>
    %174 = vector.broadcast %173 : f32 to vector<8x128xf32>
    %175 = arith.addf %172, %174 : vector<8x128xf32>
    %176 = math.tanh %175 : vector<8x128xf32>
    %177 = arith.addf %162, %165 : vector<8x128xf32>
    %178 = arith.mulf %165, %176 : vector<8x128xf32>
    %179 = arith.addf %164, %178 : vector<8x128xf32>
    %180 = arith.mulf %51, %61 : vector<8x128xf32>
    %c20 = arith.constant 20 : index
    %181 = memref.load %arg1[%c20] : memref<39xf32, #tpu.memory_space<smem>>
    %182 = vector.broadcast %181 : f32 to vector<8x128xf32>
    %183 = arith.mulf %182, %0 : vector<8x128xf32>
    %c29 = arith.constant 29 : index
    %184 = memref.load %arg1[%c29] : memref<39xf32, #tpu.memory_space<smem>>
    %185 = vector.broadcast %184 : f32 to vector<8x128xf32>
    %186 = arith.mulf %185, %1 : vector<8x128xf32>
    %187 = arith.addf %183, %186 : vector<8x128xf32>
    %c38 = arith.constant 38 : index
    %188 = memref.load %arg1[%c38] : memref<39xf32, #tpu.memory_space<smem>>
    %189 = vector.broadcast %188 : f32 to vector<8x128xf32>
    %190 = arith.addf %187, %189 : vector<8x128xf32>
    %191 = math.tanh %190 : vector<8x128xf32>
    %192 = arith.addf %177, %180 : vector<8x128xf32>
    %193 = arith.mulf %180, %191 : vector<8x128xf32>
    %194 = arith.addf %179, %193 : vector<8x128xf32>
    %195 = arith.divf %194, %192 : vector<8x128xf32>
    %c0_9 = arith.constant 0 : index
    %c0_10 = arith.constant 0 : index
    %196 = vector.load %arg4[%c0_9, %c0_10] : memref<8x128xf32, #tpu.memory_space<vmem>>, vector<8x128xf32>
    tpu.vector_store %arg4[%c0_9, %c0_10], %195 {strides = array<i32>} : memref<8x128xf32, #tpu.memory_space<vmem>>, vector<8x128xf32>,
    return
  }
  func.func @transform_0(%arg0: i32, %arg1: memref<39xf32, #tpu.memory_space<smem>>) -> (i32, i32) {
    %c0_i32 = arith.constant 0 : i32
    %c0_i32_0 = arith.constant 0 : i32
    return %arg0, %c0_i32 : i32, i32
  }
  func.func @transform_1(%arg0: i32, %arg1: memref<39xf32, #tpu.memory_space<smem>>) -> (i32, i32) {
    %c0_i32 = arith.constant 0 : i32
    %c0_i32_0 = arith.constant 0 : i32
    return %arg0, %c0_i32 : i32, i32
  }
  func.func @transform_2(%arg0: i32, %arg1: memref<39xf32, #tpu.memory_space<smem>>) -> (i32, i32) {
    %c0_i32 = arith.constant 0 : i32
    %c0_i32_0 = arith.constant 0 : i32
    return %arg0, %c0_i32 : i32, i32
  }
}

</mosaic_0001>

<bundles_post_ra>
// kernel: tpu_custom_call.1
= control target key start
LH: loop header
LB: loop body
LE: loop exit
PB: predicated region body
PF: predicated region fallthrough
CT: control target
= control target key end

     0   :  { %s812_s15 = smov [#allocation3]   ;;  %s1128_s0 = inlined_call_operand.hbm [shape: f32[39], index: 0, kind: input, shape index: {}]   ;;  %s1129_s1 = inlined_call_operand.hbm [shape: f32[24,128], index: 1, kind: input, shape index: {}]   ;;  %s1130_s2 = inlined_call_operand.hbm [shape: f32[24,128], index: 2, kind: input, shape index: {}]   ;;  %s1131_s3 = inlined_call_operand.hbm [shape: f32[24,128], index: 3, kind: output, shape index: {}]  }
   0x1   :  { %s9_s14 = sshll.u32 %s1128_s0, 4  ;;  %s10_s14 = int_to_ptr.hbm [resolvable:$true] %s9_s14 }
   0x2   :  { %12 = dma.hbm_to_smem %s10_s14, 16, %s812_s15, [#allocation2] }
   0x3   :  { %782 = dma.done.wait [#allocation2], 16 }
   0x4   :  { %783 = vsyncadd [#allocation2], 4294967280 }
   0x5   :  { %15 = sfence }
   0x6   :  { %16 = vsyncpa [#allocation5], 0 }
   0x7   :  { %18 = vsyncpa [#allocation5 + $0x1], 0 }
   0x8   :  { %19 = vsyncpa [#allocation8], 0 }
   0x9   :  { %21 = vsyncpa [#allocation8 + $0x1], 0 }
   0xa   :  { %22 = vsyncpa [#allocation6], 0 }
   0xb   :  { %24 = vsyncpa [#allocation6 + $0x1], 0  ;;  %s836_s16 = smov 0   ;;  %s838_s17 = smov 0  }
   0xc   :  { %s840_s18 = smov 0   ;;  %s842_s19 = smov 0  }
   0xd LB: > { %s857_s0 = sadd.s32 4294967295, %s810_s19   ;;  %s529_s20 = sadd.s32 4294967294, %s810_s19   ;;  %s810_s19 = sphi %s842_s19, %s1141_s19   ;;  %s806_s18 = sphi %s840_s18, %s1140_s18   ;;  %s802_s17 = sphi %s838_s17, %s1139_s17   ;;  %s798_s16 = sphi %s836_s16, %s1138_s16  }
   0xe   : > { %s861_s21 = sadd.s32 1, %s810_s19   ;;  %s37_s22 = sadd.s32 1, %s806_s18 }
   0xf   : > { %s34_s23 = ssub.s32 %s810_s19, %s861_s21  ;;  %p44_p0 = scmp.ne.s32.totalorder %s806_s18, %s802_s17 }
  0x10   : > { %p35_p1 = scmp.eq.s32.totalorder %s34_s23, 0  ;;  %p45_p2 = scmp.eq.s32.totalorder %s810_s19, 0 }
  0x11   : > { %p50_p3 = scmp.ne.s32.totalorder %s802_s17, %s798_s16  ;;  %p51_p4 = scmp.eq.s32.totalorder %s857_s0, 0 }
  0x12   : > { %s873_s24 = scalar_select %p35_p1, %s806_s18, %s37_s22  }
  0x13   : > { %p875_p5 = por %p45_p2, %p44_p0  ;;  %p879_p6 = por %p51_p4, %p50_p3 }
  0x14   : > { %p100_p7 = scmp.eq.s32.totalorder %s857_s0, 2  ;;  %p106_p8 = scmp.eq.s32.totalorder %s529_s20, 2 }
  0x15   : > { %p599_p9 = scmp.lt.s32.totalorder %s810_s19, 3  ;;  %s894_s29 = sand.u32 1, %s806_s18  }
  0x16   : > { %p885_p10 = por %p100_p7, %p44_p0  ;;  %p889_p11 = por %p106_p8, %p50_p3 }
  0x17   : > { %s533_s30 = sshll.u32 %s810_s19, 3  ;;  %s532_s4 = sshll.u32 %s894_s29, 3 }
  0x18   : > { %s134_s7 = scalar_lea.hbm %s1129_s1, %s533_s30  ;;  %s130_s9 = scalar_lea.vmem [#allocation4], %s532_s4 }
  0x19   : > { %s136_s8 = sshll.u32 %s134_s7, 4  ;;  %s138_s10 = sshll.u32 %s130_s9, 4  ;;  %s137_s8 = int_to_ptr.hbm [resolvable:$true] %s136_s8  ;;  %s139_s10 = int_to_ptr.vmem [resolvable:$true] %s138_s10 }
  0x1a   : > { %p903_p12 = pnand %p599_p9, %p875_p5  ;;  %p536_p13 = scmp.ge.s32.totalorder %s810_s19, 1 }
  0x1b   : > { %p162_p0 = scmp.lt.s32.totalorder %s810_s19, 4  ;;  %s127_s12 = scalar_lea.sflag [#allocation5], %s894_s29 }
  0x1c   : > { %s678_s13 = sshra.s32 %s137_s8, 4  ;;  %p682_p2 = pneg %p903_p12  ;;  %s679_s13 = int_to_ptr.hbm [resolvable:$true] %s678_s13 }
  0x1d   : > { %s680_s14 = scalar_lea.hbm %s679_s13, 8  ;;  %s685_s22 = scalar_lea.hbm %s1129_s1, 24 }
  0x1e   : > { %p681_p1 = scmp.ne.s32.totalorder %s679_s13, %s680_s14  ;;  %p686_p5 = scmp.lt.s32.totalorder %s679_s13, %s1129_s1 }
  0x1f   : > { %p687_p7 = scmp.lt.s32.totalorder %s685_s22, %s680_s14 }
  0x20   : > { %p683_p3 = pnand %p682_p2, %p681_p1 }
  0x21   : > { %p688_p8 = por %p687_p7, %p686_p5 }
  0x22   : > { %p684_p4 = pneg %p683_p3 }
  0x24   : > { %p689_p9 = pnand %p688_p8, %p684_p4 }
  0x26   : > { %692 = shalt.err (!%p689_p9)
}
  0x27   : > { %591 = dma.hbm_to_vmem [thread:$0]  (!%p903_p12), %s137_s8, 128, %s139_s10, %s127_s12  }
  0x28   : > { %p927_p1 = pnand %p536_p13, %p162_p0  ;;  %s153_s9 = scalar_lea.hbm %s1130_s2, %s533_s30 }
  0x29   : > { %s155_s13 = sshll.u32 %s153_s9, 4  ;;  %s149_s14 = scalar_lea.vmem [#allocation7], %s532_s4  ;;  %s156_s13 = int_to_ptr.hbm [resolvable:$true] %s155_s13 }
  0x2a   : > { %s157_s15 = sshll.u32 %s149_s14, 4  ;;  %s146_s20 = scalar_lea.sflag [#allocation8], %s894_s29  ;;  %s158_s15 = int_to_ptr.vmem [resolvable:$true] %s157_s15 }
  0x2b   : > { %s708_s22 = sshra.s32 %s156_s13, 4  ;;  %s715_s12 = scalar_lea.hbm %s1130_s2, 24  ;;  %s709_s22 = int_to_ptr.hbm [resolvable:$true] %s708_s22 }
  0x2c   : > { %s710_s23 = scalar_lea.hbm %s709_s22, 8  ;;  %p716_p4 = scmp.lt.s32.totalorder %s709_s22, %s1130_s2 }
  0x2d   : > { %p711_p3 = scmp.ne.s32.totalorder %s709_s22, %s710_s23  ;;  %p717_p5 = scmp.lt.s32.totalorder %s715_s12, %s710_s23 }
  0x2f   : > { %p713_p13 = pnand %p711_p3, %p682_p2  ;;  %p718_p7 = por %p717_p5, %p716_p4 }
  0x31   : > { %p714_p0 = pneg %p713_p13 }
  0x33   : > { %p719_p8 = pnand %p718_p7, %p714_p0 }
  0x35   : > { %722 = shalt.err (!%p719_p8)
}
  0x36   : > { %594 = dma.hbm_to_vmem [thread:$0]  (!%p903_p12), %s156_s13, 128, %s158_s15, %s146_s20  }
  0x37   : > { %166 = sbr.rel (%p927_p1) target bundleno = 136 (0x88), region = 28  ;;  %s949_s29 = sand.u32 (!%p927_p1), 1, %s802_s17  }
  0x38   : > { %s952_s4 = sshll.u32 (!%p927_p1), %s949_s29, 3  ;;  %s169_s6 = scalar_lea.sflag (!%p927_p1), [#allocation5], %s949_s29 }
  0x39   : > { %s172_s7 = scalar_lea.vmem (!%p927_p1), [#allocation4], %s952_s4 }
  0x3c   : > { %785 = dma.done.wait (%p879_p6), %s169_s6, 128  }
  0x3d   : > { %787 = vsyncadd (%p879_p6), %s169_s6, 4294967168  ;;  %s179_s11 = scalar_lea.sflag [#allocation8], %s949_s29  ;;  %s182_s5 = scalar_lea.vmem [#allocation7], %s952_s4 }
  0x3e   : > { %789 = dma.done.wait (%p879_p6), %s179_s11, 128  }
  0x3f   : > { %791 = vsyncadd (%p879_p6), %s179_s11, 4294967168  ;;  %s211_s9 = sld [smem:[#allocation3]]  ;;  %v966_v0 = vld [vmem:[%s172_s7] sm:$0xff]  ;;  %v968_v1 = vld [vmem:[%s182_s5] sm:$0xff] }
  0x40   : > { %s540_s13 = sld [smem:[#allocation3 + $0x3]] }
  0x41   : > { %s541_s14 = sld [smem:[#allocation3 + $0x6]] }
  0x42   : > { %s542_s15 = sld [smem:[#allocation3 + $0x9]] }
  0x43   : > { %s543_s20 = sld [smem:[#allocation3 + $0x1]] }
  0x44   : > { %s544_s22 = sld [smem:[#allocation3 + $0x4]] }
  0x45   : > { %v212_v2 = vstv %s211_s9  ;;  %s545_s23 = sld [smem:[#allocation3 + $0x7]] }
  0x46   : > { %v213_v3 = vsub.f32 %v966_v0, %v212_v2  ;;  %v215_v4 = vstv %s540_s13  ;;  %s546_s8 = sld [smem:[#allocation3 + $0xa]] }
  0x47   : > { %v222_v5 = vstv %s541_s14  ;;  %s547_s10 = sld [smem:[#allocation3 + $0x2]] }
  0x48   : > { %v216_v6 = vmul.f32 %v215_v4, %v213_v3  ;;  %v223_v7 = vsub.f32 %v968_v1, %v222_v5  ;;  %v225_v8 = vstv %s542_s15  ;;  %s972_s26 = sld [smem:[#allocation3 + $0x5]] }
  0x49   : > { %v232_v9 = vstv %s543_s20  ;;  %s974_s12 = sld [smem:[#allocation3 + $0x8]] }
  0x4a   : > { %v217_v10 = vmul.f32 -0.5, %v216_v6  ;;  %v226_v11 = vmul.f32 %v225_v8, %v223_v7  ;;  %v233_v12 = vsub.f32 %v966_v0, %v232_v9  ;;  %v235_v13 = vstv %s544_s22  ;;  %s977_s25 = sld [smem:[#allocation3 + $0xb]] }
  0x4b   : > { %v242_v14 = vstv %s545_s23  ;;  %s979_s30 = sld [smem:[#allocation3 + $0xc]] }
  0x4c   : > { %v218_v15 = vmul.f32 %v217_v10, %v216_v6  ;;  %v227_v16 = vmul.f32 -0.5, %v226_v11  ;;  %v236_v17 = vmul.f32 %v235_v13, %v233_v12  ;;  %v243_v18 = vsub.f32 %v968_v1, %v242_v14  ;;  %s982_s6 = sld [smem:[#allocation3 + $0x15]] }
  0x4d   : > { %v245_v19 = vstv %s546_s8  ;;  %v252_v20 = vstv %s547_s10  ;;  %s984_s7 = sld [smem:[#allocation3 + $0x1e]] }
  0x4e   : > { %v219_v21 = vmul.f32 1.442695, %v218_v15  ;;  %v228_v22 = vmul.f32 %v227_v16, %v226_v11  ;;  %v237_v23 = vmul.f32 -0.5, %v236_v17  ;;  %v246_v24 = vmul.f32 %v245_v19, %v243_v18  ;;  %s986_s11 = sld [smem:[#allocation3 + $0xd]] }
  0x4f   : > { %v253_v25 = vsub.f32 %v966_v0, %v252_v20  ;;  %v255_v26 = vstv %s972_s26  ;;  %v262_v27 = vstv %s974_s12  ;;  %s991_s5 = sld [smem:[#allocation3 + $0x16]] }
  0x50   : > { %634 = vpow2.f32 %v219_v21  ;;  %v229_v28 = vmul.f32 1.442695, %v228_v22  ;;  %v238_v29 = vmul.f32 %v237_v23, %v236_v17  ;;  %v247_v30 = vmul.f32 -0.5, %v246_v24  ;;  %s993_s9 = sld [smem:[#allocation3 + $0x1f]] }
  0x51   : > { %v256_v31 = vmul.f32 %v255_v26, %v253_v25  ;;  %v263_v32 = vsub.f32 %v968_v1, %v262_v27  ;;  %v265_v33 = vstv %s977_s25  ;;  %v273_v34 = vstv %s979_s30  ;;  %s998_s13 = sld [smem:[#allocation3 + $0xe]] }
  0x52   : > { %636 = vpow2.f32 %v229_v28  ;;  %v239_v35 = vmul.f32 1.442695, %v238_v29  ;;  %v248_v36 = vmul.f32 %v247_v30, %v246_v24  ;;  %v274_v37 = vmul.f32 %v273_v34, %v966_v0  ;;  %s1001_s14 = sld [smem:[#allocation3 + $0x17]] }
  0x53   : > { %v257_v38 = vmul.f32 -0.5, %v256_v31  ;;  %v266_v39 = vmul.f32 %v265_v33, %v263_v32  ;;  %v276_v40 = vstv %s982_s6  ;;  %v280_v41 = vstv %s984_s7  ;;  %s1005_s15 = sld [smem:[#allocation3 + $0x20]] }
  0x54   : > { %638 = vpow2.f32 %v239_v35  ;;  %v249_v42 = vmul.f32 1.442695, %v248_v36  ;;  %v277_v43 = vmul.f32 %v276_v40, %v968_v1  ;;  %v286_v44 = vstv %s986_s11  ;;  %s1009_s20 = sld [smem:[#allocation3 + $0xf]] }
  0x55   : > { %v258_v45 = vmul.f32 %v257_v38, %v256_v31  ;;  %v267_v46 = vmul.f32 -0.5, %v266_v39  ;;  %v287_v47 = vmul.f32 %v286_v44, %v966_v0  ;;  %v289_v48 = vstv %s991_s5  ;;  %s1013_s22 = sld [smem:[#allocation3 + $0x18]] }
  0x56   : > { %v1015_v49 = vpop.eup %634  ;;  %640 = vpow2.f32 %v249_v42  ;;  %v278_v50 = vadd.f32 %v277_v43, %v274_v37  ;;  %v290_v51 = vmul.f32 %v289_v48, %v968_v1  ;;  %s1018_s23 = sld [smem:[#allocation3 + $0x21]]  ;;  %v293_v54 = vstv %s993_s9 }
  0x57   : > { %v259_v52 = vmul.f32 1.442695, %v258_v45  ;;  %v268_v53 = vmul.f32 %v267_v46, %v266_v39  ;;  %v301_v55 = vstv %s998_s13  ;;  %s1022_s8 = sld [smem:[#allocation3 + $0x10]] }
  0x58   : > { %v637_v56 = vpop.eup %636  ;;  %v281_v57 = vadd.f32 %v280_v41, %v278_v50  ;;  %v291_v58 = vadd.f32 %v290_v51, %v287_v47  ;;  %v302_v59 = vmul.f32 %v301_v55, %v966_v0  ;;  %v304_v60 = vstv %s1001_s14  ;;  %s1026_s10 = sld [smem:[#allocation3 + $0x19]] }
  0x59   : > { %642 = vpow2.f32 %v259_v52  ;;  %v269_v61 = vmul.f32 1.442695, %v268_v53  ;;  %v305_v62 = vmul.f32 %v304_v60, %v968_v1  ;;  %s1029_s26 = sld [smem:[#allocation3 + $0x22]]  ;;  %v308_v3 = vstv %s1005_s15 }
  0x5a   : > { %v639_v63 = vpop.eup %638  ;;  %644 = vtanh.f32 %v281_v57  ;;  %v294_v2 = vadd.f32 %v293_v54, %v291_v58  ;;  %v316_v4 = vstv %s1009_s20  ;;  %s1033_s12 = sld [smem:[#allocation3 + $0x11]]  ;;  %v271_v8 = vmul.f32 %v637_v56, %v1015_v49 }
  0x5b   : > { %646 = vpow2.f32 %v269_v61  ;;  %v306_v5 = vadd.f32 %v305_v62, %v302_v59  ;;  %v317_v6 = vmul.f32 %v316_v4, %v966_v0  ;;  %s1036_s25 = sld [smem:[#allocation3 + $0x1a]]  ;;  %v319_v9 = vstv %s1013_s22  ;;  %s579_s22 = sshll.u32 %s857_s0, 3 }
  0x5c   : > { %v641_v7 = vpop.eup %640  ;;  %648 = vtanh.f32 %v294_v2  ;;  %s1040_s30 = sld [smem:[#allocation3 + $0x23]]  ;;  %v320_v12 = vmul.f32 %v319_v9, %v968_v1  ;;  %v314_v13 = vmul.f32 %v639_v63, %v637_v56  ;;  %v323_v14 = vstv %s1018_s23  ;;  %s421_s0 = scalar_lea.sflag [#allocation6], %s949_s29 }
  0x5d   : > { %v284_v10 = vmul.f32 %v641_v7, %v1015_v49  ;;  %v309_v11 = vadd.f32 %v308_v3, %v306_v5  ;;  %s1044_s6 = sld [smem:[#allocation3 + $0x12]]  ;;  %v331_v15 = vstv %s1022_s8  ;;  %v1053_v19 = vmul.f32 %v641_v7, %v639_v63 }
  0x5e   : > { %v334_v16 = vstv %s1026_s10  ;;  %s1049_s7 = sld [smem:[#allocation3 + $0x1b]]  ;;  %v321_v18 = vadd.f32 %v320_v12, %v317_v6  ;;  %v332_v20 = vmul.f32 %v331_v15, %v966_v0  ;;  %s431_s10 = scalar_lea.hbm %s1131_s3, %s579_s22 }
  0x5f   : > { %v1051_v17 = vpop.eup %642  ;;  %650 = vtanh.f32 %v309_v11  ;;  %s1056_s11 = sld [smem:[#allocation3 + $0x24]]  ;;  %v296_v22 = vadd.f32 %v284_v10, %v271_v8  ;;  %v335_v23 = vmul.f32 %v334_v16, %v968_v1  ;;  %v338_v24 = vstv %s1029_s26  ;;  %s208_s26 = scalar_lea.vmem [#allocation9], %s952_s4 }
  0x60   : > { %v645_v21 = vpop.eup %644  ;;  %v346_v25 = vstv %s1033_s12  ;;  %s1061_s5 = sld [smem:[#allocation3 + $0x13]]  ;;  %v324_v28 = vadd.f32 %v323_v14, %v321_v18  ;;  %v359_v35 = vmul.f32 %v1051_v17, %v637_v56  ;;  %v374_v52 = vmul.f32 %v1051_v17, %v641_v7  ;;  %s433_s12 = sshll.u32 %s208_s26, 4  ;;  %s434_s12 = int_to_ptr.vmem [resolvable:$true] %s433_s12 }
  0x61   : > { %v647_v26 = vpop.eup %646  ;;  %v283_v27 = vmul.f32 %v645_v21, %v271_v8  ;;  %v347_v29 = vmul.f32 %v346_v25, %v966_v0  ;;  %v349_v30 = vstv %s1036_s25  ;;  %s1065_s9 = sld [smem:[#allocation3 + $0x1c]]  ;;  %v336_v33 = vadd.f32 %v335_v23, %v332_v20  ;;  %s435_s25 = sshll.u32 %s431_s10, 4  ;;  %s436_s25 = int_to_ptr.hbm [resolvable:$true] %s435_s25 }
  0x62   : > { %v649_v31 = vpop.eup %648  ;;  %v299_v32 = vmul.f32 %v647_v26, %v1015_v49  ;;  %v350_v34 = vmul.f32 %v349_v30, %v968_v1  ;;  %s1070_s13 = sld [smem:[#allocation3 + $0x25]]  ;;  %652 = vtanh.f32 %v324_v28  ;;  %v353_v37 = vstv %s1040_s30  ;;  %s752_s30 = sshra.s32 %s436_s25, 4  ;;  %s753_s30 = int_to_ptr.hbm [resolvable:$true] %s752_s30 }
  0x63   : > { %v297_v36 = vmul.f32 %v649_v31, %v284_v10  ;;  %v361_v38 = vstv %s1044_s6  ;;  %s1074_s14 = sld [smem:[#allocation3 + $0x14]]  ;;  %v339_v40 = vadd.f32 %v338_v24, %v336_v33  ;;  %v344_v41 = vmul.f32 %v647_v26, %v639_v63  ;;  %s754_s6 = scalar_lea.hbm %s753_s30, 8 }
  0x64   : > { %v311_v39 = vadd.f32 %v299_v32, %v296_v22  ;;  %v351_v42 = vadd.f32 %v350_v34, %v347_v29  ;;  %s576_s15 = sld [smem:[#allocation3 + $0x1d]]  ;;  %v362_v45 = vmul.f32 %v361_v38, %v966_v0  ;;  %v364_v46 = vstv %s1049_s7  ;;  %p755_p6 = scmp.ne.s32.totalorder %s753_s30, %s754_s6 }
  0x65   : > { %v651_v43 = vpop.eup %650  ;;  %v298_v44 = vadd.f32 %v297_v36, %v283_v27  ;;  %v368_v47 = vstv %s1056_s11  ;;  %s1079_s20 = sld [smem:[#allocation3 + $0x26]]  ;;  %654 = vtanh.f32 %v339_v40  ;;  %v365_v51 = vmul.f32 %v364_v46, %v968_v1  ;;  %s758_s4 = scalar_lea.hbm %s1131_s3, 24 }
  0x66   : > { %v312_v48 = vmul.f32 %v651_v43, %v299_v32  ;;  %v326_v49 = vadd.f32 %v314_v13, %v311_v39  ;;  %v354_v50 = vadd.f32 %v353_v37, %v351_v42  ;;  %v376_v53 = vstv %s1061_s5  ;;  %p756_p12 = pnand %p755_p6, %p885_p10  ;;  %p759_p9 = scmp.lt.s32.totalorder %s753_s30, %s1131_s3 }
  0x67   : > { %v379_v54 = vstv %s1065_s9  ;;  %v377_v57 = vmul.f32 %v376_v53, %v966_v0  ;;  %v366_v59 = vadd.f32 %v365_v51, %v362_v45  ;;  %v389_v11 = vmul.f32 %v647_v26, %v1051_v17  ;;  %p760_p1 = scmp.lt.s32.totalorder %s758_s4, %s754_s6 }
  0x68   : > { %v313_v55 = vadd.f32 %v312_v48, %v298_v44  ;;  %v341_v56 = vadd.f32 %v1053_v19, %v326_v49  ;;  %656 = vtanh.f32 %v354_v50  ;;  %v653_v58 = vpop.eup %652  ;;  %v380_v60 = vmul.f32 %v379_v54, %v968_v1  ;;  %p757_p2 = pneg %p756_p12 }
  0x69   : > { %v383_v61 = vstv %s1070_s13  ;;  %v391_v62 = vstv %s1074_s14  ;;  %v327_v63 = vmul.f32 %v653_v58, %v314_v13  ;;  %v369_v5 = vadd.f32 %v368_v47, %v366_v59  ;;  %p761_p3 = por %p760_p1, %p759_p9 }
  0x6a   : > { %v356_v2 = vadd.f32 %v344_v41, %v341_v56  ;;  %v392_v3 = vmul.f32 %v391_v62, %v966_v0  ;;  %v394_v4 = vstv %s576_s15  ;;  %v381_v6 = vadd.f32 %v380_v60, %v377_v57 }
  0x6b   : > { %v395_v7 = vmul.f32 %v394_v4, %v968_v1  ;;  %v655_v8 = vpop.eup %654  ;;  %v328_v9 = vadd.f32 %v327_v63, %v313_v55  ;;  %v398_v12 = vstv %s1079_s20  ;;  %658 = vtanh.f32 %v369_v5  ;;  %p762_p13 = pnand %p761_p3, %p757_p2 }
  0x6c   : > { %v371_v10 = vadd.f32 %v359_v35, %v356_v2  ;;  %v342_v14 = vmul.f32 %v655_v8, %v1053_v19  ;;  %v384_v15 = vadd.f32 %v383_v61, %v381_v6 }
  0x6d   : > { %v396_v16 = vadd.f32 %v395_v7, %v392_v3 }
  0x6e   : > { %v657_v13 = vpop.eup %656  ;;  %v386_v18 = vadd.f32 %v374_v52, %v371_v10  ;;  %v343_v20 = vadd.f32 %v342_v14, %v328_v9  ;;  %660 = vtanh.f32 %v384_v15 }
  0x6f   : > { %v357_v0 = vmul.f32 %v657_v13, %v344_v41  ;;  %v399_v21 = vadd.f32 %v398_v12, %v396_v16 }
  0x70   : > { %v401_v22 = vadd.f32 %v389_v11, %v386_v18 }
  0x71   : > { %662 = vtanh.f32 %v399_v21  ;;  %v659_v1 = vpop.eup %658  ;;  %v358_v23 = vadd.f32 %v357_v0, %v343_v20 }
  0x72   : > { %664 = vrcp.f32 %v401_v22  ;;  %v372_v24 = vmul.f32 %v659_v1, %v359_v35  ;;  %vm409_vm0 = vweird.f32 %v401_v22  ;;  %v413_v29 = vand.u32 2147483647, %v401_v22 }
  0x73   : > { %v415_v30 = vand.u32 2147483648, %v401_v22 }
  0x74   : > { %v661_v17 = vpop.eup %660  ;;  %v373_v26 = vadd.f32 %v372_v24, %v358_v23  ;;  %vm414_vm3 = vcmp.eq.f32.partialorder %v413_v29, 8.507059e+37 }
  0x75   : > { %v387_v19 = vmul.f32 %v661_v17, %v374_v52  ;;  %v416_v35 = vor.u32 1.1754944e-38, %v415_v30 }
  0x77   : > { %v663_v25 = vpop.eup %662  ;;  %v388_v31 = vadd.f32 %v387_v19, %v373_v26 }
  0x78   : > { %v665_v27 = vpop.eup %664  ;;  %v402_v32 = vmul.f32 %v663_v25, %v389_v11 }
  0x79   : > { %v405_v28 = vmul.f32 %v665_v27, %v401_v22  ;;  %vm410_vm1 = vweird.f32 %v665_v27 }
  0x7a   : > { %vm411_vm2 = vmor %vm409_vm0, %vm410_vm1  ;;  %v403_v36 = vadd.f32 %v402_v32, %v388_v31 }
  0x7b   : > { %v406_v33 = vsub.f32 1.0, %v405_v28 }
  0x7d   : > { %v407_v34 = vmul.f32 %v665_v27, %v406_v33 }
  0x7f   : > { %v408_v37 = vadd.f32 %v665_v27, %v407_v34 }
  0x81   : > { %v412_v38 = vsel %vm411_vm2, %v665_v27, %v408_v37 }
  0x82   : > { %v417_v39 = vsel %vm414_vm3, %v416_v35, %v412_v38 }
  0x83   : > { %v418_v40 = vmul.f32 %v417_v39, %v403_v36 }
  0x85   : > { %419 = vst [vmem:[%s208_s26] sm:$0xff] %v418_v40 }
  0x86   : > { %765 = shalt.err (!%p762_p13)
}
  0x87   : > { %586 = dma.vmem_to_hbm [thread:$0]  (%p885_p10), %s434_s12, 128, %s436_s25, %s421_s0  }
  0x88 PF: > { %p600_p0 = scmp.ge.s32.totalorder %s810_s19, 2  ;;  %s447_s29 = sand.u32 1, %s798_s16  }
  0x89   : > { %s448_s13 = scalar_lea.sflag [#allocation6], %s447_s29 }
  0x8a   : > { %p596_p4 = pnand %p600_p0, %p889_p11 }
  0x8c   : > { %p597_p5 = pneg %p596_p4 }
  0x8e   : > { %793 = dma.done.wait (%p597_p5), %s448_s13, 128  }
  0x8f   : > { %795 = vsyncadd (%p597_p5), %s448_s13, 4294967168  ;;  %p27_p7 = scmp.ge.s32.totalorder %s861_s21, 5   ;;  %s1138_s16 = smov %s802_s17 }
  0x90   : > { %s1139_s17 = smov %s806_s18  ;;  %s1140_s18 = smov %s873_s24 }
  0x91   : > { %s1141_s19 = smov %s861_s21  ;;  %29 = sbr.rel (!%p27_p7) target bundleno = 13 (0xd), region = 86 }
  0x96   :  { %454 = vsyncpa [#allocation5], 1 }
  0x97   :  { %456 = vsyncpa [#allocation5 + $0x1], 1 }
  0x98   :  { %457 = vsyncpa [#allocation8], 1 }
  0x99   :  { %459 = vsyncpa [#allocation8 + $0x1], 1 }
  0x9a   :  { %460 = vsyncpa [#allocation6], 1 }
  0x9b   :  { %462 = vsyncpa [#allocation6 + $0x1], 1 }

</bundles_post_ra>
